<compile_context>
chip_gen: v5e
topology: v5e:2x2
jax: 0.10.0
libtpu: 0.0.40
codegen_flags: <defaults>
</compile_context>

<pallas_src>
import jax
import jax.numpy as jnp
from jax.experimental import pallas as pl
from jax.experimental.pallas import tpu as pltpu

_NEG_BIG = -1e30  # bias for padded classes: never wins argmax, exp() underflows to 0


def seqcls_head_kernel(hid_ref, lab_ref, w_ref, b_ref, preds_ref, part_ref):
    """One token tile: linear head (MXU bf16 in / f32 acc), masked-NLL lane partials, argmax."""
    # [TN, D] bf16 @ [D, Cp] bf16 -> [TN, Cp] f32 on the MXU, then f32 bias add.
    logits = jnp.dot(hid_ref[...], w_ref[...],
                     preferred_element_type=jnp.float32) + b_ref[...]

    # Labels travel lane-dense [1, TN]; one XLU transpose gives the per-row column.
    labels = jnp.transpose(lab_ref[...])                         # [TN, 1] int32
    valid = labels >= 0                                          # [TN, 1] bool

    # logsumexp per token (f32 math; exp sits in the EUP slot).
    m = jnp.max(logits, axis=-1, keepdims=True)                  # [TN, 1]
    lse = jnp.log(jnp.sum(jnp.exp(logits - m), axis=-1, keepdims=True)) + m  # [TN, 1]

    # One-hot of the label. Negative (ignored) labels never match a non-negative class id,
    # so their rows are all-false -> they drop out of both the NLL and the valid count.
    cls_ids = jax.lax.broadcasted_iota(jnp.int32, logits.shape, 1)
    hot = cls_ids == labels                                      # [TN, Cp] bool

    # Per-token NLL = lse - logit[label], gathered via the one-hot mask and accumulated as
    # lane partials (sublane reduce only; no logp tile). The tiny sum over lanes/tiles and
    # the divide happen in the wrapper, which keeps this grid axis free of cross-tile state.
    nll_part = jnp.sum(jnp.where(hot, lse - logits, 0.0), axis=0, keepdims=True)   # [1, Cp]
    cnt_part = jnp.sum(hot.astype(jnp.float32), axis=0, keepdims=True)             # [1, Cp]
    part_ref[...] = jnp.concatenate([nll_part, cnt_part], axis=0)                  # [2, Cp]

    # argmax over classes (first max index on ties); padded classes sit at -1e30 bias so
    # they never win. Overwrite with the label where label < 0 (matches the torch code).
    c_pad = logits.shape[-1]
    am = jnp.min(jnp.where(logits == m, cls_ids, c_pad), axis=-1, keepdims=True)   # [TN, 1]
    preds = jnp.where(valid, am, labels)                         # [TN, 1] int32
    preds_ref[...] = jnp.transpose(preds)                        # lane-dense [1, TN] store


def seqcls_forward(input_ids, attention_mask, trigger_labels, params, *, tile_n=1024):
    assert tile_n % 128 == 0, "tile_n must be a multiple of 128 (lane-dense label/pred rows)"

    emb, w, b = params["embedding"], params["cls_w"], params["cls_b"]
    B, S = input_ids.shape
    D = emb.shape[1]
    C = w.shape[1]
    N = B * S

    # TODO(synk): transformers.AutoModel pretrained encoder has no in-script equivalent;
    # stand-in encoder = deterministic token-embedding lookup gated by attention_mask.
    # TODO(synk): the embedding gather could be fused into the kernel (scalar-prefetched ids
    # + double-buffered row-gather DMA on a pl.ANY ref) to remove the remaining N*D bf16
    # HBM write+read; kept as a single fused bf16 XLA op for robustness.

    tile = min(tile_n, pl.cdiv(N, 128) * 128)     # don't over-pad tiny inputs
    num_tiles = pl.cdiv(N, tile)
    n_pad = num_tiles * tile
    c_pad = max(128, pl.cdiv(C, 128) * 128)

    # Dominant [N, D] stream: cast the table once, then gather + mask multiply + pad in
    # bf16 (single fused pass; padded token rows are zero and carry label -100).
    emb_bf = emb.astype(jnp.bfloat16)
    hid2d = (emb_bf[input_ids] * attention_mask[..., None].astype(jnp.bfloat16)
             ).reshape(N, D)
    if n_pad != N:
        hid2d = jnp.pad(hid2d, ((0, n_pad - N), (0, 0)))

    # Lane-dense label row; padded tokens get -100 (invalid -> excluded everywhere).
    lab2d = trigger_labels.reshape(1, N).astype(jnp.int32)
    if n_pad != N:
        lab2d = jnp.pad(lab2d, ((0, 0), (0, n_pad - N)), constant_values=-100)

    # Class padding: zero weight columns + -1e30 bias keep padded classes inert.
    w_pad = jnp.zeros((D, c_pad), jnp.bfloat16).at[:, :C].set(w.astype(jnp.bfloat16))
    b_pad = jnp.full((1, c_pad), _NEG_BIG, jnp.float32).at[0, :C].set(b.astype(jnp.float32))

    cost = pl.CostEstimate(
        flops=2 * n_pad * D * c_pad,
        transcendentals=n_pad * c_pad,
        bytes_accessed=(n_pad * D * 2 + n_pad * 4 + D * c_pad * 2 + c_pad * 4
                        + n_pad * 4 + num_tiles * 2 * c_pad * 4),
    )

    # VMEM budget: double-buffered hidden/label/pred/partial tiles + resident (revisited)
    # weight/bias + ~8 live [tile, c_pad] f32/i32 temporaries, with 1.5x headroom; floored
    # at 32 MiB and capped at 60% of this generation's physical VMEM (v7x has 64 MiB).
    est = (2 * tile * D * 2 + 2 * D * c_pad * 2 + 2 * c_pad * 4
           + 2 * 2 * tile * 4 + 2 * 2 * c_pad * 4
           + 8 * tile * c_pad * 4)
    try:
        vmem_cap = int(pltpu.get_tpu_info().vmem_capacity_bytes)
    except Exception:
        vmem_cap = 64 * 1024 * 1024
    vmem_limit = int(min(max(est + est // 2, 32 * 1024 * 1024), (vmem_cap * 6) // 10))

    preds, parts = pl.pallas_call(
        seqcls_head_kernel,
        out_shape=(jax.ShapeDtypeStruct((1, n_pad), jnp.int32),
                   jax.ShapeDtypeStruct((num_tiles, 2, c_pad), jnp.float32)),
        grid_spec=pltpu.PrefetchScalarGridSpec(
            num_scalar_prefetch=0,
            grid=(num_tiles,),
            in_specs=[
                pl.BlockSpec((tile, D), lambda t: (t, 0)),      # hidden tile (bf16)
                pl.BlockSpec((1, tile), lambda t: (0, t)),      # labels (lane-dense)
                pl.BlockSpec((D, c_pad), lambda t: (0, 0)),     # classifier weight (revisited)
                pl.BlockSpec((1, c_pad), lambda t: (0, 0)),     # classifier bias (revisited)
            ],
            out_specs=(
                pl.BlockSpec((1, tile), lambda t: (0, t)),          # predictions (lane-dense)
                pl.BlockSpec((None, 2, c_pad), lambda t: (t, 0, 0)),  # per-tile loss partials
            ),
        ),
        compiler_params=pltpu.CompilerParams(
            # No cross-tile state -> the token axis is a true parallel axis: v7x megacore
            # shards tiles across its two TensorCores; no-op on single-TC v5e/v6e.
            dimension_semantics=("parallel",),
            vmem_limit_bytes=vmem_limit,
        ),
        cost_estimate=cost,
    )(hid2d, lab2d, w_pad, b_pad)

    # Tiny final reduction in JAX (also removes the serial f32 accumulator drift).
    nll_sum = jnp.sum(parts[:, 0, :])
    valid_cnt = jnp.sum(parts[:, 1, :])
    # NOTE: NaN if no token has a valid label (0/0) -- matches torch CrossEntropyLoss.
    loss = nll_sum / valid_cnt

    return {
        "loss": loss,
        "prediction": preds[0, :N].reshape(B, S),   # int32 (torch returns int64)
        "label": trigger_labels.astype(jnp.int32),
    }


if __name__ == "__main__":
    key = jax.random.PRNGKey(0)
    k_emb, k_w, k_b, k_ids, k_lab = jax.random.split(key, 5)

    B, S, D, C, V = 2, 8, 32, 8, 64   # batch, seq, d_model, nclass, vocab
    params = {
        "embedding": jax.random.normal(k_emb, (V, D), jnp.float32) * 0.02,
        "cls_w": jax.random.normal(k_w, (D, C), jnp.float32) * (1.0 / D ** 0.5),
        "cls_b": jax.random.normal(k_b, (C,), jnp.float32) * 0.01,
    }

    input_ids = jax.random.randint(k_ids, (B, S), 0, V, dtype=jnp.int32)
    attention_mask = jnp.ones((B, S), jnp.int32).at[:, S - 2:].set(0)
    trigger_labels = jax.random.randint(k_lab, (B, S), 0, C, dtype=jnp.int32)
    trigger_labels = jnp.where(attention_mask == 1, trigger_labels, -100)

    out = seqcls_forward(input_ids, attention_mask, trigger_labels, params)
    jax.block_until_ready(out)

    # Plain-JAX reference of the head + loss + preds (same bf16 rounding of MXU inputs).
    hid_bf = (params["embedding"].astype(jnp.bfloat16)[input_ids]
              * attention_mask[..., None].astype(jnp.bfloat16)).astype(jnp.float32)
    w_bf = params["cls_w"].astype(jnp.bfloat16).astype(jnp.float32)
    logits = (hid_bf.reshape(-1, D) @ w_bf + params["cls_b"]).reshape(B, S, C)
    logp = jax.nn.log_softmax(logits, axis=-1)
    valid = trigger_labels >= 0
    nll = -jnp.take_along_axis(logp, jnp.maximum(trigger_labels, 0)[..., None], axis=-1)[..., 0]
    ref_loss = jnp.sum(jnp.where(valid, nll, 0.0)) / jnp.sum(valid)
    ref_pred = jnp.where(valid, jnp.argmax(logits, axis=-1).astype(jnp.int32), trigger_labels)

    assert jnp.allclose(out["loss"], ref_loss, atol=1e-4, rtol=1e-4), (out["loss"], ref_loss)
    assert jnp.array_equal(out["prediction"], ref_pred), (out["prediction"], ref_pred)

    print("KERNEL_OK")
</pallas_src>

<mosaic_0001>
module attributes {stable_mosaic.version = 11 : i64} {
  func.func @seqcls_head_kernel(%arg0: i32, %arg1: memref<128x32xbf16, #tpu.memory_space<vmem>>, %arg2: memref<1x128xi32, #tpu.memory_space<vmem>>, %arg3: memref<32x128xbf16, #tpu.memory_space<vmem>>, %arg4: memref<1x128xf32, #tpu.memory_space<vmem>>, %arg5: memref<1x128xi32, #tpu.memory_space<vmem>>, %arg6: memref<1x2x128xf32, #tpu.memory_space<vmem>>) attributes {dimension_semantics = [#tpu.dimension_semantics<parallel>], iteration_bounds = array<i64: 1>, scalar_prefetch = 0 : i64, scratch_operands = 0 : i64, tpu.core_type = #tpu.core_type<tc>, window_params = [{transform_indices = @transform_0, window_bounds = array<i64: 128, 32>}, {transform_indices = @transform_1, window_bounds = array<i64: 1, 128>}, {pipeline_mode = #tpu.pipeline_mode<synchronous>, transform_indices = @transform_2, window_bounds = array<i64: 32, 128>}, {pipeline_mode = #tpu.pipeline_mode<synchronous>, transform_indices = @transform_3, window_bounds = array<i64: 1, 128>}, {transform_indices = @transform_4, window_bounds = array<i64: 1, 128>}, {transform_indices = @transform_5, window_bounds = array<i64: 1, 2, 128>}]} {
    %c0 = arith.constant 0 : index
    %c0_0 = arith.constant 0 : index
    %0 = vector.load %arg1[%c0, %c0_0] : memref<128x32xbf16, #tpu.memory_space<vmem>>, vector<128x32xbf16>
    %c0_1 = arith.constant 0 : index
    %c0_2 = arith.constant 0 : index
    %1 = vector.load %arg3[%c0_1, %c0_2] : memref<32x128xbf16, #tpu.memory_space<vmem>>, vector<32x128xbf16>
    %cst = arith.constant dense<0.000000e+00> : vector<128x128xf32>
    %2 = tpu.matmul %0, %1, %cst {dimension_numbers = #tpu.dot_dimension_numbers<[1], [0], [0], [1], [0, 0, 1, 1], [], []>} : vector<128x32xbf16>, vector<32x128xbf16>, vector<128x128xf32> -> vector<128x128xf32>
    %c0_3 = arith.constant 0 : index
    %c0_4 = arith.constant 0 : index
    %3 = vector.load %arg4[%c0_3, %c0_4] : memref<1x128xf32, #tpu.memory_space<vmem>>, vector<1x128xf32>
    %4 = vector.broadcast %3 : vector<1x128xf32> to vector<128x128xf32>
    %5 = arith.addf %2, %4 : vector<128x128xf32>
    %c0_5 = arith.constant 0 : index
    %c0_6 = arith.constant 0 : index
    %6 = vector.load %arg2[%c0_5, %c0_6] : memref<1x128xi32, #tpu.memory_space<vmem>>, vector<1x128xi32>
    %7 = tpu.transpose %6, [1, 0] : vector<1x128xi32> -> vector<128x1xi32>
    %c0_i32 = arith.constant 0 : i32
    %8 = vector.broadcast %c0_i32 : i32 to vector<128x1xi32>
    %9 = arith.cmpi sge, %7, %8 : vector<128x1xi32>
    %cst_7 = arith.constant dense<0xFF800000> : vector<128xf32>
    %10 = vector.multi_reduction <maximumf>, %5, %cst_7 [1] : vector<128x128xf32> to vector<128xf32>
    %11 = vector.shape_cast %10 : vector<128xf32> to vector<128x1xf32>
    %12 = vector.broadcast %11 : vector<128x1xf32> to vector<128x128xf32>
    %13 = arith.subf %5, %12 : vector<128x128xf32>
    %14 = math.exp %13 : vector<128x128xf32>
    %cst_8 = arith.constant dense<0.000000e+00> : vector<128xf32>
    %15 = vector.multi_reduction <add>, %14, %cst_8 [1] : vector<128x128xf32> to vector<128xf32>
    %16 = vector.shape_cast %15 : vector<128xf32> to vector<128x1xf32>
    %17 = math.log %16 : vector<128x1xf32>
    %18 = arith.addf %17, %11 : vector<128x1xf32>
    %19 = tpu.iota {dimensions = array<i32: 1>} : vector<128x128xi32>
    %20 = vector.broadcast %7 : vector<128x1xi32> to vector<128x128xi32>
    %21 = arith.cmpi eq, %19, %20 : vector<128x128xi32>
    %22 = vector.broadcast %18 : vector<128x1xf32> to vector<128x128xf32>
    %23 = arith.subf %22, %5 : vector<128x128xf32>
    %cst_9 = arith.constant 0.000000e+00 : f32
    %24 = vector.broadcast %cst_9 : f32 to vector<128x128xf32>
    %25 = arith.select %21, %23, %24 : vector<128x128xi1>, vector<128x128xf32>
    %cst_10 = arith.constant dense<0.000000e+00> : vector<128xf32>
    %26 = vector.multi_reduction <add>, %25, %cst_10 [0] : vector<128x128xf32> to vector<128xf32>
    %27 = vector.shape_cast %26 : vector<128xf32> to vector<1x128xf32>
    %28 = arith.extui %21 : vector<128x128xi1> to vector<128x128xi32>
    %29 = arith.sitofp %28 : vector<128x128xi32> to vector<128x128xf32>
    %cst_11 = arith.constant dense<0.000000e+00> : vector<128xf32>
    %30 = vector.multi_reduction <add>, %29, %cst_11 [0] : vector<128x128xf32> to vector<128xf32>
    %31 = vector.shape_cast %30 : vector<128xf32> to vector<1x128xf32>
    %32 = tpu.concatenate %27, %31 in 0 : vector<1x128xf32>, vector<1x128xf32> -> vector<2x128xf32>
    %c0_12 = arith.constant 0 : index
    %c0_13 = arith.constant 0 : index
    %c0_14 = arith.constant 0 : index
    %33 = vector.load %arg6[%c0_12, %c0_13, %c0_14] : memref<1x2x128xf32, #tpu.memory_space<vmem>>, vector<1x2x128xf32>
    %34 = vector.shape_cast %33 : vector<1x2x128xf32> to vector<2x128xf32>
    %35 = vector.shape_cast %32 : vector<2x128xf32> to vector<1x2x128xf32>
    tpu.vector_store %arg6[%c0_12, %c0_13, %c0_14], %35 {strides = array<i32>} : memref<1x2x128xf32, #tpu.memory_space<vmem>>, vector<1x2x128xf32>,
    %36 = vector.broadcast %11 : vector<128x1xf32> to vector<128x128xf32>
    %37 = arith.cmpf oeq, %5, %36 : vector<128x128xf32>
    %c128_i32 = arith.constant 128 : i32
    %38 = vector.broadcast %c128_i32 : i32 to vector<128x128xi32>
    %39 = arith.select %37, %19, %38 : vector<128x128xi1>, vector<128x128xi32>
    %cst_15 = arith.constant dense<2147483647> : vector<128xi32>
    %40 = vector.multi_reduction <minsi>, %39, %cst_15 [1] : vector<128x128xi32> to vector<128xi32>
    %41 = vector.shape_cast %40 : vector<128xi32> to vector<128x1xi32>
    %42 = arith.select %9, %41, %7 : vector<128x1xi1>, vector<128x1xi32>
    %43 = tpu.transpose %42, [1, 0] : vector<128x1xi32> -> vector<1x128xi32>
    %c0_16 = arith.constant 0 : index
    %c0_17 = arith.constant 0 : index
    %44 = vector.load %arg5[%c0_16, %c0_17] : memref<1x128xi32, #tpu.memory_space<vmem>>, vector<1x128xi32>
    tpu.vector_store %arg5[%c0_16, %c0_17], %43 {strides = array<i32>} : memref<1x128xi32, #tpu.memory_space<vmem>>, vector<1x128xi32>,
    return
  }
  func.func @transform_0(%arg0: i32) -> (i32, i32) {
    %c0_i32 = arith.constant 0 : i32
    %c0_i32_0 = arith.constant 0 : i32
    return %arg0, %c0_i32 : i32, i32
  }
  func.func @transform_1(%arg0: i32) -> (i32, i32) {
    %c0_i32 = arith.constant 0 : i32
    %c0_i32_0 = arith.constant 0 : i32
    return %c0_i32, %arg0 : i32, i32
  }
  func.func @transform_2(%arg0: i32) -> (i32, i32) {
    %c0_i32 = arith.constant 0 : i32
    %c0_i32_0 = arith.constant 0 : i32
    %c0_i32_1 = arith.constant 0 : i32
    return %c0_i32, %c0_i32_0 : i32, i32
  }
  func.func @transform_3(%arg0: i32) -> (i32, i32) {
    %c0_i32 = arith.constant 0 : i32
    %c0_i32_0 = arith.constant 0 : i32
    %c0_i32_1 = arith.constant 0 : i32
    return %c0_i32, %c0_i32_0 : i32, i32
  }
  func.func @transform_4(%arg0: i32) -> (i32, i32) {
    %c0_i32 = arith.constant 0 : i32
    %c0_i32_0 = arith.constant 0 : i32
    return %c0_i32, %arg0 : i32, i32
  }
  func.func @transform_5(%arg0: i32) -> (i32, i32, i32) {
    %c0_i32 = arith.constant 0 : i32
    %c0_i32_0 = arith.constant 0 : i32
    %c0_i32_1 = arith.constant 0 : i32
    return %arg0, %c0_i32, %c0_i32_0 : i32, i32, i32
  }
}

</mosaic_0001>

<bundles_post_ra>
// kernel: tpu_custom_call.1
= control target key start
LH: loop header
LB: loop body
LE: loop exit
PB: predicated region body
PF: predicated region fallthrough
CT: control target
= control target key end

     0   :  { %11 = vsyncpa [#allocation3], 0  ;;  %v1097_v2 = vmov 0   ;;  %s1860_s0 = inlined_call_operand.vmem [shape: bf16[128,32], index: 0, kind: input, shape index: {}]   ;;  %s1861_s1 = inlined_call_operand.vmem [shape: s32[1,128], index: 1, kind: input, shape index: {}]   ;;  %s1862_s2 = inlined_call_operand.vmem [shape: bf16[32,128], index: 2, kind: input, shape index: {}]   ;;  %s1863_s3 = inlined_call_operand.vmem [shape: f32[1,128], index: 3, kind: input, shape index: {}]   ;;  %s1864_s4 = inlined_call_operand.hbm [shape: s32[1,128], index: 4, kind: output, shape index: {0}]   ;;  %s1865_s5 = inlined_call_operand.hbm [shape: f32[1,2,128], index: 5, kind: output, shape index: {1}]  }
   0x1   :  { %v172_v0 = vld [vmem:[%s1861_s1] sm:$0x1]  ;;  %v966_v1 = vld [vmem:[%s1862_s2 + $0x8] sm:$0xff]  ;;  %977 = vset.pattern.permute.xlu2 %v1097_v2 }
   0x2   :  { %173 = vxpose.xlu0.b32.start.end [1/1] (short) %v172_v0, 128  ;;  %129 = vmatpush.bf16.msra.mxu0 %v966_v1  ;;  %v965_v3 = vld [vmem:[%s1862_s2] sm:$0xff] }
   0x3   :  { %967 = vmatpush.bf16.msra.mxu1 %v966_v1 }
   0x4   :  { %12 = vsyncpa [#allocation5], 0  ;;  %968 = vmatpush.bf16.msra.mxu2 %v966_v1  ;;  %969 = vmatpush.bf16.msra.mxu3 %v966_v1  ;;  %v957_v4 = vld [vmem:[%s1860_s0] sm:$0xff]  ;;  %v959_v5 = vld [vmem:[%s1860_s0 + $0x10] sm:$0xff]  ;;  %vm98_vm0 = vcmask 261120   ;;  %v381_v30 = vlaneseq  ;;  %v1866_v34 = vmov 0.0  }
   0x5   :  { %978 = vset.pattern.permute.xlu1 %v1097_v2  ;;  %v961_v6 = vld [vmem:[%s1860_s0 + $0x20] sm:$0xff]  ;;  %v963_v7 = vld [vmem:[%s1860_s0 + $0x30] sm:$0xff]  ;;  %v958_v10 = vld [vmem:[%s1860_s0 + $0x8] sm:$0xff]  ;;  %s879_s17 = sshll.u32 %s1865_s5, 4  ;;  %s1100_s5 = smov [#allocation2]   ;;  %s880_s17 = int_to_ptr.hbm [resolvable:$true] %s879_s17 }
   0x6   :  { %130 = vmatpush.bf16.msra.mxu0 %v965_v3  ;;  %v960_v15 = vld [vmem:[%s1860_s0 + $0x18] sm:$0xff]  ;;  %v962_v16 = vld [vmem:[%s1860_s0 + $0x28] sm:$0xff]  ;;  %v1199_v20 = vld [vmem:[%s1863_s3] ss:$0 sm:$0xff]  ;;  %v1224_v31 = vand.u32 127, %v381_v30  ;;  %s866_s18 = sshll.u32 %s1100_s5, 4  ;;  %s867_s18 = int_to_ptr.vmem [resolvable:$true] %s866_s18 }
   0x7   :  { %970 = vmatpush.bf16.msra.mxu1 %v965_v3  ;;  %v964_v18 = vld [vmem:[%s1860_s0 + $0x38] sm:$0xff]  ;;  %s1099_s0 = smov [#allocation4]   ;;  %s868_s21 = sshll.u32 %s1864_s4, 4  ;;  %s869_s21 = int_to_ptr.hbm [resolvable:$true] %s868_s21 }
   0x8   :  { %971 = vmatpush.bf16.msra.mxu2 %v965_v3  ;;  %972 = vmatpush.bf16.msra.mxu3 %v965_v3  ;;  %s877_s3 = sshll.u32 %s1099_s0, 4  ;;  %s878_s3 = int_to_ptr.vmem [resolvable:$true] %s877_s3 }
   0x9   :  { %933 = vmatmul.msk.bf16.vlgmr.msra.gmra.mxu0 %vm98_vm0, %v957_v4 }
   0xa   :  { %935 = vmatmul.msk.bf16.vlgmr.msra.gmra.mxu1 %vm98_vm0, %v959_v5 }
   0xb   :  { %937 = vmatmul.msk.bf16.vlgmr.msra.gmra.mxu2 %vm98_vm0, %v961_v6  ;;  %939 = vmatmul.msk.bf16.vlgmr.msra.gmra.mxu3 %vm98_vm0, %v963_v7 }
  0x19   :  { %934 = vmatmul.msk.bf16.gmra.mxu0 %vm98_vm0, %v958_v10 }
  0x1a   :  { %936 = vmatmul.msk.bf16.gmra.mxu1 %vm98_vm0, %v960_v15 }
  0x1b   :  { %938 = vmatmul.msk.bf16.gmra.mxu2 %vm98_vm0, %v962_v16  ;;  %940 = vmatmul.msk.bf16.gmra.mxu3 %vm98_vm0, %v964_v18 }
  0x69   :  { %979 = vset.pattern.permute.xlu0 %v1097_v2 }
  0x86   :  { %v132_v21 = vpop.f32.mrf.mxu0 }
  0x87   :  { %v1205_v23 = vadd.f32 %v1199_v20, %v132_v21  ;;  %v142_v36 = vpop.f32.mrf.mxu1 }
  0x88   :  { %v1247_v38 = vadd.f32 %v1199_v20, %v142_v36 }
  0x8e   :  { %v134_v44 = vpop.f32.mrf.mxu0  ;;  %v152_v45 = vpop.f32.mrf.mxu2 }
  0x8f   :  { %v1259_v46 = vadd.f32 %v1199_v20, %v152_v45  ;;  %v1262_v47 = vadd.f32 %v1199_v20, %v134_v44  ;;  %v162_v48 = vpop.f32.mrf.mxu3  ;;  %v144_v49 = vpop.f32.mrf.mxu1 }
  0x90   :  { %v1267_v50 = vadd.f32 %v1199_v20, %v162_v48  ;;  %v1270_v51 = vadd.f32 %v1199_v20, %v144_v49 }
  0x96   :  { %v154_v55 = vpop.f32.mrf.mxu2  ;;  %v137_v0 = vpop.f32.mrf.mxu0 }
  0x97   :  { %v1291_v59 = vadd.f32 %v1199_v20, %v154_v55  ;;  %v164_v60 = vpop.f32.mrf.mxu3  ;;  %v1315_v4 = vadd.f32 %v1199_v20, %v137_v0 }
  0x98   :  { %v1295_v61 = vadd.f32 %v1199_v20, %v164_v60 }
  0x99   :  { %1946 = vst [vmem:[#allocation22_spill] sm:$0xff] %v1291_v59 }
  0x9a   :  { %1947 = vst [vmem:[#allocation23_spill] sm:$0xff] %v1295_v61 }
  0x9e   :  { %v157_v48 = vpop.f32.mrf.mxu2 }
  0x9f   :  { %v167_v55 = vpop.f32.mrf.mxu3 }
  0xa6   :  { %v1156_v8 = vpop.trf.xlu0 }
  0xa7   :  { %1932 = vst [vmem:[#allocation8_spill] sm:$0xff] %v1156_v8  ;;  %384 = vperm.xlu2 %977, %v1156_v8  }
  0xae   :  { %v1159_v9 = vpop.trf.xlu0 }
  0xaf   :  { %1933 = vst [vmem:[#allocation9_spill] sm:$0xff] %v1159_v9  ;;  %387 = vperm.xlu1 %978, %v1159_v9  }
  0xb6   :  { %v1166_v11 = vpop.trf.xlu0 }
  0xb7   :  { %1934 = vst [vmem:[#allocation10_spill] sm:$0xff] %v1166_v11  ;;  %390 = vperm.xlu2 %977, %v1166_v11  }
  0xbe   :  { %v1169_v12 = vpop.trf.xlu0 }
  0xbf   :  { %1935 = vst [vmem:[#allocation11_spill] sm:$0xff] %v1169_v12  ;;  %393 = vperm.xlu2 %977, %v1169_v12  }
  0xc6   :  { %v1172_v13 = vpop.trf.xlu0 }
  0xc7   :  { %1936 = vst [vmem:[#allocation12_spill] sm:$0xff] %v1172_v13  ;;  %396 = vperm.xlu1 %978, %v1172_v13  }
  0xce   :  { %v1175_v14 = vpop.trf.xlu0 }
  0xcf   :  { %1937 = vst [vmem:[#allocation13_spill] sm:$0xff] %v1175_v14  ;;  %399 = vperm.xlu2 %977, %v1175_v14  }
  0xd6   :  { %v1186_v17 = vpop.trf.xlu0 }
  0xd7   :  { %1938 = vst [vmem:[#allocation14_spill] sm:$0xff] %v1186_v17  ;;  %402 = vperm.xlu1 %978, %v1186_v17  }
  0xde   :  { %v1193_v19 = vpop.trf.xlu0 }
  0xdf   :  { %1939 = vst [vmem:[#allocation15_spill] sm:$0xff] %v1193_v19  ;;  %405 = vperm.xlu2 %977, %v1193_v19  }
  0xe6   :  { %v1201_v22 = vpop.trf.xlu0 }
  0xe7   :  { %1940 = vst [vmem:[#allocation16_spill] sm:$0xff] %v1201_v22  ;;  %408 = vperm.xlu1 %978, %v1201_v22  }
  0xeb   :  { %221 = vmax.xlane.f32.xlu0 %v1205_v23 }
  0xee   :  { %v1208_v24 = vpop.trf.xlu0 }
  0xef   :  { %1941 = vst [vmem:[#allocation17_spill] sm:$0xff] %v1208_v24  ;;  %411 = vperm.xlu2 %977, %v1208_v24  }
  0xf6   :  { %v1211_v25 = vpop.trf.xlu0 }
  0xf7   :  { %1942 = vst [vmem:[#allocation18_spill] sm:$0xff] %v1211_v25  ;;  %414 = vperm.xlu1 %978, %v1211_v25  }
  0xfe   :  { %v1214_v26 = vpop.trf.xlu0 }
  0xff   :  { %1943 = vst [vmem:[#allocation19_spill] sm:$0xff] %v1214_v26  ;;  %417 = vperm.xlu2 %977, %v1214_v26  }
 0x101   :  { %v1220_v28 = vpop.permute.xlu2 %384 }
 0x102   :  { %vm431_vm1 = vcmp.eq.s32.totalorder %v1224_v31, %v1220_v28 }
 0x103   :  { %v941_v35 = vsel %vm431_vm1, 1.0, %v1866_v34 }
 0x106   :  { %v1217_v27 = vpop.trf.xlu0 }
 0x107   :  { %1944 = vst [vmem:[#allocation20_spill] sm:$0xff] %v1217_v27  ;;  %420 = vperm.xlu1 %978, %v1217_v27  }
 0x10e   :  { %v1317_v6 = vpop.trf.xlu0 }
 0x10f   :  { %1950 = vst [vmem:[#allocation26_spill] sm:$0xff] %v1317_v6 }
 0x111   :  { %v1222_v29 = vpop.permute.xlu2 %390 }
 0x112   :  { %vm433_vm2 = vcmp.eq.s32.totalorder %v1224_v31, %v1222_v29 }
 0x113   :  { %v943_v40 = vsel %vm433_vm2, 1.0, %v1866_v34 }
 0x116   :  { %v1337_v30 = vpop.trf.xlu0 }
 0x117   :  { %1952 = vst [vmem:[#allocation28_spill] sm:$0xff] %v1337_v30 }
 0x119   :  { %v1228_v32 = vpop.permute.xlu2 %393 }
 0x11a   :  { %1945 = vst [vmem:[#allocation21_spill] sm:$0xff] %v1228_v32  ;;  %vm434_vm4 = vcmp.eq.s32.totalorder %v1224_v31, %v1228_v32 }
 0x11b   :  { %v944_v42 = vsel %vm434_vm4, 1.0, %v1866_v34 }
 0x121   :  { %v1230_v33 = vpop.permute.xlu1 %387 }
 0x122   :  { %vm432_vm3 = vcmp.eq.s32.totalorder %v1224_v31, %v1230_v33 }
 0x123   :  { %v942_v37 = vsel %vm432_vm3, 1.0, %v1866_v34 }
 0x124   :  { %v532_v39 = vadd.f32 %v942_v37, %v941_v35 }
 0x126   :  { %v533_v41 = vadd.f32 %v943_v40, %v532_v39  ;;  %v147_v40 = vpop.f32.mrf.mxu1 }
 0x128   :  { %229 = vmax.xlane.f32.xlu2 %v1247_v38  ;;  %v534_v43 = vadd.f32 %v944_v42, %v533_v41  ;;  %v1351_v41 = vadd.f32 %v1199_v20, %v147_v40 }
 0x129   :  { %v1272_v52 = vpop.permute.xlu2 %399 }
 0x12a   :  { %vm436_vm5 = vcmp.eq.s32.totalorder %v1224_v31, %v1272_v52  ;;  %1955 = vst [vmem:[#allocation31_spill] sm:$0xff] %v1351_v41 }
 0x12b   :  { %v946_v57 = vsel %vm436_vm5, 1.0, %v1866_v34 }
 0x12e   :  { %v149_v60 = vpop.f32.mrf.mxu1 }
 0x12f   :  { %v1381_v0 = vadd.f32 %v1199_v20, %v149_v60 }
 0x130   :  { %237 = vmax.xlane.f32.xlu2 %v1259_v46 }
 0x131   :  { %223 = vmax.xlane.f32.xlu1 %v1262_v47  ;;  %1959 = vst [vmem:[#allocation35_spill] sm:$0xff] %v1381_v0 }
 0x138   :  { %245 = vmax.xlane.f32.xlu2 %v1267_v50 }
 0x139   :  { %v1275_v53 = vpop.permute.xlu1 %396  ;;  %231 = vmax.xlane.f32.xlu1 %v1270_v51  ;;  %v1297_v62 = vpop.permute.xlu2 %405 }
 0x13a   :  { %vm435_vm6 = vcmp.eq.s32.totalorder %v1224_v31, %v1275_v53  ;;  %1948 = vst [vmem:[#allocation24_spill] sm:$0xff] %v1297_v62  ;;  %vm438_vm7 = vcmp.eq.s32.totalorder %v1224_v31, %v1297_v62 }
 0x13b   :  { %v945_v54 = vsel %vm435_vm6, 1.0, %v1866_v34  ;;  %v948_v3 = vsel %vm438_vm7, 1.0, %v1866_v34 }
 0x13c   :  { %v535_v56 = vadd.f32 %v945_v54, %v534_v43  ;;  %v1369_v54 = vadd.f32 %v1199_v20, %v157_v48 }
 0x13e   :  { %v536_v58 = vadd.f32 %v946_v57, %v535_v56  ;;  %1956 = vst [vmem:[#allocation32_spill] sm:$0xff] %v1369_v54  ;;  %v1373_v56 = vadd.f32 %v1199_v20, %v167_v55  ;;  %v139_v57 = vpop.f32.mrf.mxu0 }
 0x140   :  { %1957 = vst [vmem:[#allocation33_spill] sm:$0xff] %v1373_v56 }
 0x141   :  { %239 = vmax.xlane.f32.xlu1 %v1291_v59 }
 0x149   :  { %v1299_v63 = vpop.permute.xlu1 %402  ;;  %247 = vmax.xlane.f32.xlu1 %v1295_v61  ;;  %v1321_v7 = vpop.permute.xlu2 %411 }
 0x14a   :  { %1949 = vst [vmem:[#allocation25_spill] sm:$0xff] %v1299_v63  ;;  %vm437_vm8 = vcmp.eq.s32.totalorder %v1224_v31, %v1299_v63  ;;  %vm440_vm9 = vcmp.eq.s32.totalorder %v1224_v31, %v1321_v7 }
 0x14b   :  { %v947_v1 = vsel %vm437_vm8, 1.0, %v1866_v34  ;;  %1951 = vst [vmem:[#allocation27_spill] sm:$0xff] %v1321_v7  ;;  %v950_v18 = vsel %vm440_vm9, 1.0, %v1866_v34 }
 0x14c   :  { %v537_v2 = vadd.f32 %v947_v1, %v536_v58  ;;  %v1377_v58 = vadd.f32 %v1199_v20, %v139_v57  ;;  %v1383_v1 = vpop.trf.xlu0 }
 0x14d   :  { %1960 = vst [vmem:[#allocation36_spill] sm:$0xff] %v1383_v1 }
 0x14e   :  { %v538_v5 = vadd.f32 %v948_v3, %v537_v2  ;;  %1958 = vst [vmem:[#allocation34_spill] sm:$0xff] %v1377_v58  ;;  %v159_v2 = vpop.f32.mrf.mxu2 }
 0x14f   :  { %v1387_v3 = vadd.f32 %v1199_v20, %v159_v2 }
 0x150   :  { %423 = vperm.xlu2 %977, %v1317_v6  }
 0x151   :  { %225 = vmax.xlane.f32.xlu1 %v1315_v4  ;;  %1961 = vst [vmem:[#allocation37_spill] sm:$0xff] %v1387_v3 }
 0x159   :  { %v1323_v10 = vpop.permute.xlu1 %408  ;;  %v1348_v39 = vpop.permute.xlu2 %417 }
 0x15a   :  { %vm439_vm10 = vcmp.eq.s32.totalorder %v1224_v31, %v1323_v10  ;;  %1954 = vst [vmem:[#allocation30_spill] sm:$0xff] %v1348_v39  ;;  %vm442_vm12 = vcmp.eq.s32.totalorder %v1224_v31, %v1348_v39 }
 0x15b   :  { %v949_v15 = vsel %vm439_vm10, 1.0, %v1866_v34  ;;  %v952_v42 = vsel %vm442_vm12, 1.0, %v1866_v34 }
 0x15c   :  { %v539_v16 = vadd.f32 %v949_v15, %v538_v5 }
 0x15e   :  { %v540_v21 = vadd.f32 %v950_v18, %v539_v16  ;;  %v1392_v15 = vpop.xlane.xlu0 %221  ;;  %v169_v16 = vpop.f32.mrf.mxu3 }
 0x15f   :  { %vm556_vm14 = vcmp.eq.f32.partialorder %v1205_v23, %v1392_v15  ;;  %v1397_v18 = vadd.f32 %v1199_v20, %v169_v16 }
 0x161   :  { %1962 = vst [vmem:[#allocation38_spill] sm:$0xff] %v1397_v18 }
 0x169   :  { %v1339_v35 = vpop.permute.xlu1 %414 }
 0x16a   :  { %1953 = vst [vmem:[#allocation29_spill] sm:$0xff] %v1339_v35  ;;  %vm441_vm11 = vcmp.eq.s32.totalorder %v1224_v31, %v1339_v35  ;;  %426 = vperm.xlu1 %978, %v1337_v30  }
 0x16b   :  { %v951_v36 = vsel %vm441_vm11, 1.0, %v1866_v34 }
 0x16c   :  { %v541_v37 = vadd.f32 %v951_v36, %v540_v21  ;;  %v1402_v36 = vsel %vm556_vm14, %v1224_v31, 128 }
 0x16d   :  { %v589_v20 = vshra.s32 %v1402_v36, 16 }
 0x16e   :  { %v542_v44 = vadd.f32 %v952_v42, %v541_v37 }
 0x16f   :  { %v1419_v55 = vcvt.s32.f32 %v589_v20 }
 0x179   :  { %v1359_v43 = vpop.permute.xlu1 %420  ;;  %233 = vmax.xlane.f32.xlu2 %v1351_v41 }
 0x17a   :  { %vm443_vm13 = vcmp.eq.s32.totalorder %v1224_v31, %v1359_v43 }
 0x17b   :  { %v953_v45 = vsel %vm443_vm13, 1.0, %v1866_v34 }
 0x17c   :  { %v543_v49 = vadd.f32 %v953_v45, %v542_v44 }
 0x181   :  { %241 = vmax.xlane.f32.xlu2 %v1369_v54 }
 0x189   :  { %249 = vmax.xlane.f32.xlu2 %v1373_v56 }
 0x191   :  { %227 = vmax.xlane.f32.xlu2 %v1377_v58 }
 0x194   :  { %235 = vmax.xlane.f32.xlu1 %v1381_v0 }
 0x19b   :  { %v1389_v5 = vpop.xlane.xlu2 %229 }
 0x19c   :  { %243 = vmax.xlane.f32.xlu1 %v1387_v3  ;;  %vm560_vm14 = vcmp.eq.f32.partialorder %v1247_v38, %v1389_v5  ;;  %v257_v17 = vsub.f32 %v1247_v38, %v1389_v5 }
 0x19d   :  { %v1442_v30 = vsel %vm560_vm14, %v1224_v31, 128 }
 0x19e   :  { %v277_v14 = vmul.f32 1.442695, %v257_v17 }
 0x1a3   :  { %v1399_v21 = vpop.xlane.xlu2 %237 }
 0x1a4   :  { %251 = vmax.xlane.f32.xlu1 %v1397_v18  ;;  %v1405_v37 = vpop.xlane.xlu1 %223  ;;  %v261_v12 = vsub.f32 %v1259_v46, %v1399_v21 }
 0x1a5   :  { %v254_v40 = vsub.f32 %v1262_v47, %v1405_v37  ;;  %vm557_vm15 = vcmp.eq.f32.partialorder %v1262_v47, %v1405_v37 }
 0x1a6   :  { %v1412_v42 = vsel %vm557_vm15, %v1224_v31, 128 }
 0x1a7   :  { %v603_v44 = vshra.s32 %v1412_v42, 16  ;;  %v271_v45 = vmul.f32 1.442695, %v254_v40 }
 0x1a9   :  { %429 = vperm.xlu2 %977, %v1383_v1   ;;  %v1417_v48 = vcvt.s32.f32 %v603_v44  ;;  %981 = vpow2.f32 %v271_v45  ;;  %v1965_v44 = vmov 0.0  }
 0x1ab   :  { %v1421_v57 = vpop.xlane.xlu2 %245  ;;  %606 = vmin.xlane.f32.xlu0 %v1417_v48 }
 0x1ac   :  { %v1424_v60 = vpop.xlane.xlu1 %231  ;;  %592 = vmin.xlane.f32.xlu1 %v1419_v55 }
 0x1ad   :  { %v258_v2 = vsub.f32 %v1270_v51, %v1424_v60  ;;  %vm561_vm14 = vcmp.eq.f32.partialorder %v1270_v51, %v1424_v60 }
 0x1af   :  { %v279_v16 = vmul.f32 1.442695, %v258_v2  ;;  %v982_v40 = vpop.eup %981 }
 0x1b1   :  { %983 = vpow2.f32 %v279_v16  ;;  %v645_v16 = vshra.s32 %v1442_v30, 16 }
 0x1b3   :  { %v1429_v34 = vpop.permute.xlu2 %423  ;;  %v1449_v26 = vcvt.s32.f32 %v645_v16 }
 0x1b4   :  { %1963 = vst [vmem:[#allocation39_spill] sm:$0xff] %v1429_v34  ;;  %vm444_vm0 = vcmp.eq.s32.totalorder %v1224_v31, %v1429_v34  ;;  %v1433_v20 = vpop.xlane.xlu1 %239  ;;  %303 = vadd.xlane.f32.xlu1 %v982_v40 }
 0x1b5   :  { %1964 = vst [vmem:[#allocation40_spill] sm:$0xff] %v1433_v20  ;;  %v954_v1 = vsel %vm444_vm0, 1.0, %v1965_v44  ;;  %v262_v40 = vsub.f32 %v1291_v59, %v1433_v20 }
 0x1b6   :  { %v544_v45 = vadd.f32 %v954_v1, %v543_v49  ;;  %v253_v49 = vsub.f32 %v1205_v23, %v1392_v15 }
 0x1b7   :  { %v984_v2 = vpop.eup %983  ;;  %v287_v27 = vmul.f32 1.442695, %v262_v40 }
 0x1b8   :  { %v269_v40 = vmul.f32 1.442695, %v253_v49 }
 0x1b9   :  { %985 = vpow2.f32 %v287_v27  ;;  %v1469_v27 = vsel %vm561_vm14, %v1224_v31, 128 }
 0x1ba   :  { %987 = vpow2.f32 %v269_v40  ;;  %v659_v49 = vshra.s32 %v1469_v27, 16 }
 0x1bc   :  { %v1444_v6 = vpop.xlane.xlu1 %247  ;;  %311 = vadd.xlane.f32.xlu1 %v984_v2 }
 0x1bd   :  { %1966 = vst [vmem:[#allocation41_spill] sm:$0xff] %v1444_v6  ;;  %v266_v25 = vsub.f32 %v1295_v61, %v1444_v6 }
 0x1bf   :  { %v295_v24 = vmul.f32 1.442695, %v266_v25  ;;  %v986_v19 = vpop.eup %985 }
 0x1c0   :  { %v988_v25 = vpop.eup %987 }
 0x1c1   :  { %989 = vpow2.f32 %v295_v24 }
 0x1c2   :  { %991 = vpow2.f32 %v277_v14 }
 0x1c4   :  { %v1453_v1 = vpop.xlane.xlu1 %225  ;;  %648 = vmin.xlane.f32.xlu1 %v1449_v26 }
 0x1c5   :  { %vm558_vm15 = vcmp.eq.f32.partialorder %v1315_v4, %v1453_v1 }
 0x1c6   :  { %v1461_v2 = vsel %vm558_vm15, %v1224_v31, 128  ;;  %vm564_vm15 = vcmp.eq.f32.partialorder %v1259_v46, %v1399_v21 }
 0x1c7   :  { %v617_v16 = vshra.s32 %v1461_v2, 16  ;;  %v1480_v13 = vsel %vm564_vm15, %v1224_v31, 128  ;;  %v990_v40 = vpop.eup %989  ;;  %vm565_vm15 = vcmp.eq.f32.partialorder %v1291_v59, %v1433_v20 }
 0x1c8   :  { %v701_v17 = vshra.s32 %v1480_v13, 16  ;;  %v992_v24 = vpop.eup %991 }
 0x1c9   :  { %v1466_v22 = vcvt.s32.f32 %v617_v16  ;;  %v1477_v16 = vcvt.s32.f32 %v659_v49  ;;  %v265_v49 = vsub.f32 %v1267_v50, %v1421_v57 }
 0x1ca   :  { %v1486_v11 = vcvt.s32.f32 %v701_v17 }
 0x1cb   :  { %620 = vmin.xlane.f32.xlu0 %v1466_v22 }
 0x1cc   :  { %319 = vadd.xlane.f32.xlu1 %v986_v19  ;;  %v285_v19 = vmul.f32 1.442695, %v261_v12 }
 0x1ce   :  { %993 = vpow2.f32 %v285_v19 }
 0x1d2   :  { %301 = vadd.xlane.f32.xlu2 %v988_v25  ;;  %v293_v25 = vmul.f32 1.442695, %v265_v49 }
 0x1d3   :  { %662 = vmin.xlane.f32.xlu0 %v1477_v16 }
 0x1d4   :  { %327 = vadd.xlane.f32.xlu1 %v990_v40  ;;  %v994_v17 = vpop.eup %993  ;;  %995 = vpow2.f32 %v293_v25 }
 0x1da   :  { %309 = vadd.xlane.f32.xlu2 %v992_v24  ;;  %v996_v19 = vpop.eup %995  ;;  %v1502_v24 = vsel %vm565_vm15, %v1224_v31, 128 }
 0x1db   :  { %704 = vmin.xlane.f32.xlu0 %v1486_v11  ;;  %v715_v8 = vshra.s32 %v1502_v24, 16 }
 0x1dc   :  { %v1491_v14 = vpop.permute.xlu1 %426 }
 0x1dd   :  { %1967 = vst [vmem:[#allocation42_spill] sm:$0xff] %v1491_v14  ;;  %vm1900_vm14 = vcmp.eq.s32.totalorder %v1224_v31, %v1491_v14  ;;  %v1509_v49 = vcvt.s32.f32 %v715_v8 }
 0x1de   :  { %v955_v12 = vsel %vm1900_vm14, 1.0, %v1965_v44 }
 0x1df   :  { %v545_v40 = vadd.f32 %v955_v12, %v544_v45  ;;  %1969 = vst [vmem:[#allocation44_spill] sm:$0xff] %v1509_v49  ;;  %v255_v12 = vsub.f32 %v1315_v4, %v1453_v1 }
 0x1e1   :  { %v273_v8 = vmul.f32 1.442695, %v255_v12 }
 0x1e2   :  { %317 = vadd.xlane.f32.xlu2 %v994_v17 }
 0x1e3   :  { %997 = vpow2.f32 %v273_v8 }
 0x1e9   :  { %v998_v59 = vpop.eup %997 }
 0x1ea   :  { %325 = vadd.xlane.f32.xlu2 %v996_v19 }
 0x1ec   :  { %v1504_v9 = vpop.xlane.xlu2 %233 }
 0x1ed   :  { %1968 = vst [vmem:[#allocation43_spill] sm:$0xff] %v1504_v9  ;;  %vm562_vm14 = vcmp.eq.f32.partialorder %v1351_v41, %v1504_v9  ;;  %v259_v35 = vsub.f32 %v1351_v41, %v1504_v9 }
 0x1ee   :  { %v1512_v45 = vsel %vm562_vm14, %v1224_v31, 128 }
 0x1ef   :  { %v673_v17 = vshra.s32 %v1512_v45, 16  ;;  %v281_v62 = vmul.f32 1.442695, %v259_v35  ;;  %v672_v29 = vand.u32 65535, %v1512_v45 }
 0x1f1   :  { %v1526_v34 = vcvt.s32.f32 %v673_v17  ;;  %999 = vpow2.f32 %v281_v62 }
 0x1f2   :  { %718 = vmin.xlane.f32.xlu2 %v1509_v49 }
 0x1f4   :  { %v1517_v25 = vpop.xlane.xlu2 %241 }
 0x1f5   :  { %1970 = vst [vmem:[#allocation45_spill] sm:$0xff] %v1517_v25  ;;  %vm566_vm15 = vcmp.eq.f32.partialorder %v1369_v54, %v1517_v25  ;;  %v263_v35 = vsub.f32 %v1369_v54, %v1517_v25 }
 0x1f6   :  { %v1523_v19 = vsel %vm566_vm15, %v1224_v31, 128 }
 0x1f7   :  { %v729_v14 = vshra.s32 %v1523_v19, 16  ;;  %v1000_v8 = vpop.eup %999  ;;  %v289_v9 = vmul.f32 1.442695, %v263_v35 }
 0x1f9   :  { %v1528_v39 = vcvt.s32.f32 %v729_v14 }
 0x1fa   :  { %676 = vmin.xlane.f32.xlu2 %v1526_v34 }
 0x1fb   :  { %732 = vmin.xlane.f32.xlu1 %v1528_v39 }
 0x1fc   :  { %v1534_v7 = vpop.xlane.xlu2 %249 }
 0x1fd   :  { %1971 = vst [vmem:[#allocation46_spill] sm:$0xff] %v1534_v7 }
 0x202   :  { %305 = vadd.xlane.f32.xlu2 %v998_v59 }
 0x204   :  { %v1536_v12 = vpop.xlane.xlu2 %227 }
 0x205   :  { %vm559_vm14 = vcmp.eq.f32.partialorder %v1377_v58, %v1536_v12  ;;  %v256_v14 = vsub.f32 %v1377_v58, %v1536_v12 }
 0x206   :  { %v1550_v59 = vsel %vm559_vm14, %v1224_v31, 128 }
 0x207   :  { %v1542_v17 = vpop.xlane.xlu1 %235  ;;  %v275_v20 = vmul.f32 1.442695, %v256_v14  ;;  %v631_v58 = vshra.s32 %v1550_v59, 16 }
 0x208   :  { %1972 = vst [vmem:[#allocation47_spill] sm:$0xff] %v1542_v17  ;;  %vm563_vm15 = vcmp.eq.f32.partialorder %v1381_v0, %v1542_v17  ;;  %v260_v14 = vsub.f32 %v1381_v0, %v1542_v17 }
 0x209   :  { %v1547_v63 = vsel %vm563_vm15, %v1224_v31, 128  ;;  %1001 = vpow2.f32 %v275_v20  ;;  %v1575_v25 = vcvt.s32.f32 %v631_v58 }
 0x20a   :  { %313 = vadd.xlane.f32.xlu2 %v1000_v8  ;;  %v687_v62 = vshra.s32 %v1547_v63, 16  ;;  %1003 = vpow2.f32 %v289_v9 }
 0x20c   :  { %v1555_v41 = vpop.permute.xlu2 %429  ;;  %v1557_v32 = vcvt.s32.f32 %v687_v62 }
 0x20d   :  { %1973 = vst [vmem:[#allocation48_spill] sm:$0xff] %v1555_v41  ;;  %vm1917_vm15 = vcmp.eq.s32.totalorder %v1224_v31, %v1555_v41 }
 0x20e   :  { %v956_v8 = vsel %vm1917_vm15, 1.0, %v1965_v44  ;;  %690 = vmin.xlane.f32.xlu1 %v1557_v32  ;;  %vm570_vm15 = vcmp.eq.f32.partialorder %v1373_v56, %v1534_v7  ;;  %v267_v44 = vsub.f32 %v1373_v56, %v1534_v7 }
 0x20f   :  { %v1569_v54 = vadd.f32 %v956_v8, %v545_v40  ;;  %v1571_v62 = vpop.xlane.xlu1 %243  ;;  %v283_v40 = vmul.f32 1.442695, %v260_v14  ;;  %v1002_v8 = vpop.eup %1001  ;;  %v1589_v58 = vsel %vm570_vm15, %v1224_v31, 128  ;;  %vm568_vm15 = vcmp.eq.f32.partialorder %v1267_v50, %v1421_v57 }
 0x210   :  { %1975 = vst [vmem:[#allocation50_spill] sm:$0xff] %v1571_v62  ;;  %vm567_vm14 = vcmp.eq.f32.partialorder %v1387_v3, %v1571_v62  ;;  %v297_v41 = vmul.f32 1.442695, %v267_v44  ;;  %v785_v0 = vshra.s32 %v1589_v58, 16  ;;  %v1004_v9 = vpop.eup %1003  ;;  %v264_v44 = vsub.f32 %v1387_v3, %v1571_v62 }
 0x211   :  { %1974 = vst [vmem:[#allocation49_spill] sm:$0xff] %v1569_v54  ;;  %v1578_v49 = vsel %vm567_vm14, %v1224_v31, 128  ;;  %1005 = vpow2.f32 %v283_v40  ;;  %vm569_vm14 = vcmp.eq.f32.partialorder %v1295_v61, %v1444_v6 }
 0x212   :  { %634 = vmin.xlane.f32.xlu2 %v1575_v25  ;;  %v743_v20 = vshra.s32 %v1578_v49, 16  ;;  %1007 = vpow2.f32 %v297_v41  ;;  %v1597_v14 = vcvt.s32.f32 %v785_v0  ;;  %v1600_v56 = vsel %vm569_vm14, %v1224_v31, 128 }
 0x213   :  { %v1611_v0 = vsel %vm568_vm15, %v1224_v31, 128 }
 0x214   :  { %v1586_v35 = vcvt.s32.f32 %v743_v20  ;;  %v757_v7 = vshra.s32 %v1611_v0, 16 }
 0x216   :  { %746 = vmin.xlane.f32.xlu0 %v1586_v35  ;;  %307 = vadd.xlane.f32.xlu1 %v1002_v8  ;;  %v771_v8 = vshra.s32 %v1600_v56, 16  ;;  %v1621_v62 = vcvt.s32.f32 %v757_v7 }
 0x217   :  { %v1592_v54 = vpop.xlane.xlu1 %251  ;;  %v1006_v20 = vpop.eup %1005 }
 0x218   :  { %1976 = vst [vmem:[#allocation51_spill] sm:$0xff] %v1592_v54  ;;  %v1008_v41 = vpop.eup %1007  ;;  %v1613_v61 = vcvt.s32.f32 %v771_v8  ;;  %vm571_vm14 = vcmp.eq.f32.partialorder %v1397_v18, %v1592_v54 }
 0x21a   :  { %321 = vadd.xlane.f32.xlu2 %v1004_v9  ;;  %v291_v9 = vmul.f32 1.442695, %v264_v44  ;;  %1977 = vst [vmem:[#allocation52_spill] sm:$0xff] %v1613_v61 }
 0x21c   :  { %1009 = vpow2.f32 %v291_v9 }
 0x21e   :  { %788 = vmin.xlane.f32.xlu0 %v1597_v14  ;;  %315 = vadd.xlane.f32.xlu1 %v1006_v20  ;;  %v268_v20 = vsub.f32 %v1397_v18, %v1592_v54  ;;  %v588_v54 = vand.u32 65535, %v1402_v36 }
 0x21f   :  { %v1607_v40 = vpop.xlane.xlu1 %592 }
 0x220   :  { %v299_v44 = vmul.f32 1.442695, %v268_v20  ;;  %vm594_vm15 = vcmp.eq.f32.partialorder %v1419_v55, %v1607_v40 }
 0x222   :  { %329 = vadd.xlane.f32.xlu2 %v1008_v41  ;;  %v1624_v41 = vsel %vm571_vm14, %v1224_v31, 128  ;;  %v1010_v6 = vpop.eup %1009 }
 0x223   :  { %1978 = vst [vmem:[#allocation53_spill] sm:$0xff] %v1624_v41  ;;  %v799_v8 = vshra.s32 %v1624_v41, 16 }
 0x225   :  { %v1628_v18 = vcvt.s32.f32 %v799_v8 }
 0x226   :  { %774 = vmin.xlane.f32.xlu1 %v1613_v61 }
 0x227   :  { %v304_v3 = vpop.xlane.xlu1 %303 }
 0x228   :  { %1011 = vlog2.f32 %v304_v3 }
 0x229   :  { %1013 = vpow2.f32 %v299_v44  ;;  %v1637_v44 = vpop.xlane.xlu0 %606 }
 0x22a   :  { %760 = vmin.xlane.f32.xlu2 %v1621_v62  ;;  %vm608_vm14 = vcmp.eq.f32.partialorder %v1417_v48, %v1637_v44 }
 0x22e   :  { %v1012_v17 = vpop.eup %1011  ;;  %323 = vadd.xlane.f32.xlu1 %v1010_v6 }
 0x22f   :  { %v336_v9 = vmul.f32 0.6931472, %v1012_v17  ;;  %v312_v61 = vpop.xlane.xlu1 %311  ;;  %v1014_v20 = vpop.eup %1013  ;;  %v602_v17 = vand.u32 65535, %v1412_v42 }
 0x230   :  { %1015 = vlog2.f32 %v312_v61 }
 0x231   :  { %v366_v7 = vadd.f32 %v336_v9, %v1405_v37  ;;  %v590_v37 = vcvt.s32.f32 %v588_v54  ;;  %v604_v9 = vcvt.s32.f32 %v602_v17 }
 0x232   :  { %802 = vmin.xlane.f32.xlu2 %v1628_v18 }
 0x233   :  { %v448_v3 = vsub.f32 %v366_v7, %v1262_v47  ;;  %v595_v8 = vsel %vm594_vm15, %v590_v37, inf  ;;  %v644_v7 = vand.u32 65535, %v1442_v30  ;;  %v609_v42 = vsel %vm608_vm14, %v604_v9, inf }
 0x235   :  { %v464_v41 = vsel %vm432_vm3, %v448_v3, 0.0  ;;  %v646_v48 = vcvt.s32.f32 %v644_v7 }
 0x236   :  { %v1016_v6 = vpop.eup %1015  ;;  %331 = vadd.xlane.f32.xlu1 %v1014_v20 }
 0x237   :  { %v344_v61 = vmul.f32 0.6931472, %v1016_v6  ;;  %v1646_v36 = vpop.xlane.xlu1 %648  ;;  %v658_v6 = vand.u32 65535, %v1469_v27 }
 0x238   :  { %vm650_vm3 = vcmp.eq.f32.partialorder %v1449_v26, %v1646_v36 }
 0x239   :  { %v370_v47 = vadd.f32 %v344_v61, %v1424_v60  ;;  %v651_v60 = vsel %vm650_vm3, %v646_v48, inf  ;;  %v660_v26 = vcvt.s32.f32 %v658_v6 }
 0x23a   :  { %596 = vmin.xlane.f32.xlu2 %v595_v8  ;;  %v700_v8 = vand.u32 65535, %v1480_v13 }
 0x23b   :  { %v452_v33 = vsub.f32 %v370_v47, %v1270_v51  ;;  %v616_v51 = vand.u32 65535, %v1461_v2 }
 0x23d   :  { %v1652_v54 = vsel %vm436_vm5, %v452_v33, 0.0  ;;  %v618_v30 = vcvt.s32.f32 %v616_v51 }
 0x23e   :  { %610 = vmin.xlane.f32.xlu1 %v609_v42  ;;  %v1654_v55 = vpop.xlane.xlu0 %620 }
 0x23f   :  { %vm622_vm15 = vcmp.eq.f32.partialorder %v1466_v22, %v1654_v55  ;;  %v320_v28 = vpop.xlane.xlu1 %319 }
 0x240   :  { %v623_v52 = vsel %vm622_vm15, %v618_v30, inf }
 0x242   :  { %652 = vmin.xlane.f32.xlu2 %v651_v60 }
 0x245   :  { %v302_v3 = vpop.xlane.xlu2 %301 }
 0x246   :  { %1017 = vlog2.f32 %v302_v3  ;;  %624 = vmin.xlane.f32.xlu1 %v623_v52  ;;  %v1661_v20 = vpop.xlane.xlu0 %662 }
 0x247   :  { %vm664_vm5 = vcmp.eq.f32.partialorder %v1477_v16, %v1661_v20  ;;  %v702_v16 = vcvt.s32.f32 %v700_v8  ;;  %v1692_v53 = vpop.xlane.xlu1 %327  ;;  %v686_v8 = vand.u32 65535, %v1547_v63 }
 0x248   :  { %v665_v17 = vsel %vm664_vm5, %v660_v26, inf }
 0x24c   :  { %v1018_v61 = vpop.eup %1017 }
 0x24d   :  { %v334_v2 = vmul.f32 0.6931472, %v1018_v61  ;;  %v310_v37 = vpop.xlane.xlu2 %309 }
 0x24e   :  { %1019 = vlog2.f32 %v310_v37  ;;  %666 = vmin.xlane.f32.xlu1 %v665_v17  ;;  %v1667_v47 = vpop.xlane.xlu0 %704 }
 0x24f   :  { %v365_v22 = vadd.f32 %v334_v2, %v1392_v15  ;;  %vm706_vm14 = vcmp.eq.f32.partialorder %v1486_v11, %v1667_v47  ;;  %v728_v2 = vand.u32 65535, %v1523_v19 }
 0x250   :  { %v707_v51 = vsel %vm706_vm14, %v702_v16, inf  ;;  %v688_v16 = vcvt.s32.f32 %v686_v8 }
 0x251   :  { %v447_v33 = vsub.f32 %v365_v22, %v1205_v23  ;;  %v730_v37 = vcvt.s32.f32 %v728_v2 }
 0x253   :  { %v463_v27 = vsel %vm431_vm1, %v447_v33, 0.0 }
 0x254   :  { %v1020_v9 = vpop.eup %1019  ;;  %v479_v7 = vadd.f32 %v464_v41, %v463_v27 }
 0x255   :  { %v342_v42 = vmul.f32 0.6931472, %v1020_v9  ;;  %v318_v48 = vpop.xlane.xlu2 %317  ;;  %v630_v9 = vand.u32 65535, %v1550_v59 }
 0x256   :  { %1021 = vlog2.f32 %v318_v48  ;;  %708 = vmin.xlane.f32.xlu1 %v707_v51 }
 0x257   :  { %v369_v15 = vadd.f32 %v342_v42, %v1389_v5 }
 0x259   :  { %v451_v13 = vsub.f32 %v369_v15, %v1247_v38 }
 0x25b   :  { %v1681_v11 = vsel %vm435_vm6, %v451_v13, 0.0  ;;  %v784_v13 = vand.u32 65535, %v1589_v58 }
 0x25c   :  { %v1022_v23 = vpop.eup %1021 }
 0x25d   :  { %v350_v60 = vmul.f32 0.6931472, %v1022_v23  ;;  %v326_v30 = vpop.xlane.xlu2 %325 }
 0x25e   :  { %1023 = vlog2.f32 %v326_v30 }
 0x25f   :  { %v373_v41 = vadd.f32 %v350_v60, %v1399_v21 }
 0x261   :  { %v455_v3 = vsub.f32 %v373_v41, %v1259_v46 }
 0x263   :  { %v1688_v5 = vsel %vm439_vm10, %v455_v3, 0.0 }
 0x264   :  { %v1024_v38 = vpop.eup %1023 }
 0x265   :  { %v358_v52 = vmul.f32 0.6931472, %v1024_v38  ;;  %v1690_v6 = vpop.xlane.xlu2 %718 }
 0x267   :  { %v377_v26 = vadd.f32 %v358_v52, %v1421_v57  ;;  %v714_v52 = vand.u32 65535, %v1502_v24  ;;  %v770_v24 = vand.u32 65535, %v1600_v56 }
 0x269   :  { %v459_v61 = vsub.f32 %v377_v26, %v1267_v50  ;;  %v1979_v26 = vld [vmem:[#allocation44_spill] sm:$0xff] }
 0x26a   :  { %vm720_vm15 = vcmp.eq.f32.partialorder %v1979_v26, %v1690_v6  ;;  %v1992_v26 = vld [vmem:[#allocation32_spill] sm:$0xff] }
 0x26b   :  { %v1700_v46 = vsel %vm443_vm13, %v459_v61, 0.0  ;;  %v1980_v61 = vld [vmem:[#allocation43_spill] sm:$0xff] }
 0x26d   :  { %v1702_v10 = vpop.xlane.xlu2 %676 }
 0x26e   :  { %v1704_v21 = vpop.xlane.xlu1 %732  ;;  %vm678_vm13 = vcmp.eq.f32.partialorder %v1526_v34, %v1702_v10 }
 0x26f   :  { %vm734_vm1 = vcmp.eq.f32.partialorder %v1528_v39, %v1704_v21 }
 0x270   :  { %v735_v17 = vsel %vm734_vm1, %v730_v37, inf  ;;  %v1981_v37 = vld [vmem:[#allocation34_spill] sm:$0xff] }
 0x271   :  { %736 = vmin.xlane.f32.xlu2 %v735_v17 }
 0x275   :  { %v306_v57 = vpop.xlane.xlu2 %305 }
 0x276   :  { %1025 = vlog2.f32 %v306_v57 }
 0x27c   :  { %v1026_v50 = vpop.eup %1025 }
 0x27d   :  { %v338_v22 = vmul.f32 0.6931472, %v1026_v50  ;;  %v314_v19 = vpop.xlane.xlu2 %313  ;;  %v716_v50 = vcvt.s32.f32 %v714_v52 }
 0x27e   :  { %1027 = vlog2.f32 %v314_v19 }
 0x27f   :  { %v367_v43 = vadd.f32 %v338_v22, %v1453_v1  ;;  %v632_v1 = vcvt.s32.f32 %v630_v9  ;;  %v721_v8 = vsel %vm720_vm15, %v716_v50, inf  ;;  %v1983_v9 = vld [vmem:[#allocation31_spill] sm:$0xff] }
 0x281   :  { %v449_v33 = vsub.f32 %v367_v43, %v1315_v4  ;;  %v1711_v27 = vpop.xlane.xlu1 %690  ;;  %v742_v4 = vand.u32 65535, %v1578_v49 }
 0x282   :  { %vm692_vm6 = vcmp.eq.f32.partialorder %v1557_v32, %v1711_v27 }
 0x283   :  { %v465_v39 = vsel %vm433_vm2, %v449_v33, 0.0  ;;  %v693_v42 = vsel %vm692_vm6, %v688_v16, inf  ;;  %v744_v15 = vcvt.s32.f32 %v742_v4  ;;  %v756_v16 = vand.u32 65535, %v1611_v0 }
 0x284   :  { %v480_v48 = vadd.f32 %v479_v7, %v465_v39  ;;  %694 = vmin.xlane.f32.xlu2 %v693_v42  ;;  %v1028_v23 = vpop.eup %1027 }
 0x285   :  { %v1719_v63 = vpop.xlane.xlu2 %634  ;;  %v346_v45 = vmul.f32 0.6931472, %v1028_v23  ;;  %v1988_v23 = vld [vmem:[#allocation45_spill] sm:$0xff] }
 0x286   :  { %vm636_vm10 = vcmp.eq.f32.partialorder %v1575_v25, %v1719_v63  ;;  %v674_v25 = vcvt.s32.f32 %v672_v29 }
 0x287   :  { %v637_v51 = vsel %vm636_vm10, %v632_v1, inf  ;;  %v371_v2 = vadd.f32 %v346_v45, %v1980_v61 }
 0x288   :  { %638 = vmin.xlane.f32.xlu0 %v637_v51  ;;  %v679_v60 = vsel %vm678_vm13, %v674_v25, inf  ;;  %v772_v51 = vcvt.s32.f32 %v770_v24 }
 0x289   :  { %v308_v59 = vpop.xlane.xlu1 %307  ;;  %v1724_v32 = vpop.xlane.xlu0 %746  ;;  %v453_v39 = vsub.f32 %v371_v2, %v1983_v9 }
 0x28a   :  { %1029 = vlog2.f32 %v308_v59  ;;  %vm748_vm2 = vcmp.eq.f32.partialorder %v1586_v35, %v1724_v32  ;;  %v786_v35 = vcvt.s32.f32 %v784_v13  ;;  %v1984_v59 = vld [vmem:[#allocation52_spill] sm:$0xff] }
 0x28b   :  { %v749_v7 = vsel %vm748_vm2, %v744_v15, inf  ;;  %1031 = vlog2.f32 %v320_v28  ;;  %v1985_v15 = vld [vmem:[#allocation40_spill] sm:$0xff]  ;;  %v469_v13 = vsel %vm437_vm8, %v453_v39, 0.0 }
 0x28c   :  { %750 = vmin.xlane.f32.xlu1 %v749_v7  ;;  %v1986_v7 = vld [vmem:[#allocation47_spill] sm:$0xff] }
 0x28d   :  { %v322_v49 = vpop.xlane.xlu2 %321 }
 0x28e   :  { %1033 = vlog2.f32 %v322_v49 }
 0x290   :  { %v1030_v30 = vpop.eup %1029  ;;  %680 = vmin.xlane.f32.xlu0 %v679_v60 }
 0x291   :  { %v340_v41 = vmul.f32 0.6931472, %v1030_v30  ;;  %v316_v3 = vpop.xlane.xlu1 %315  ;;  %v1732_v38 = vpop.xlane.xlu0 %788  ;;  %v1989_v30 = vld [vmem:[#allocation35_spill] sm:$0xff] }
 0x292   :  { %1035 = vlog2.f32 %v316_v3  ;;  %vm790_vm3 = vcmp.eq.f32.partialorder %v1597_v14, %v1732_v38  ;;  %v1032_v28 = vpop.eup %1031 }
 0x293   :  { %v368_v34 = vadd.f32 %v340_v41, %v1536_v12  ;;  %v791_v58 = vsel %vm790_vm3, %v786_v35, inf  ;;  %v352_v19 = vmul.f32 0.6931472, %v1032_v28  ;;  %v758_v41 = vcvt.s32.f32 %v756_v16  ;;  %v1990_v35 = vld [vmem:[#allocation22_spill] sm:$0xff] }
 0x294   :  { %792 = vmin.xlane.f32.xlu1 %v791_v58  ;;  %v1034_v22 = vpop.eup %1033  ;;  %1037 = vlog2.f32 %v1692_v53 }
 0x295   :  { %v450_v17 = vsub.f32 %v368_v34, %v1981_v37  ;;  %v330_v57 = vpop.xlane.xlu2 %329  ;;  %v354_v42 = vmul.f32 0.6931472, %v1034_v22  ;;  %v374_v29 = vadd.f32 %v352_v19, %v1985_v15  ;;  %v1993_v37 = vld [vmem:[#allocation53_spill] sm:$0xff]  ;;  %v1998_v15 = vld [vmem:[#allocation46_spill] sm:$0xff]  ;;  %v599_v19 = vcvt.f32.s32 %v1607_v40 }
 0x296   :  { %1039 = vlog2.f32 %v330_v57 }
 0x297   :  { %v466_v12 = vsel %vm434_vm4, %v450_v17, 0.0  ;;  %v375_v60 = vadd.f32 %v354_v42, %v1988_v23  ;;  %v798_v17 = vand.u32 65535, %v1993_v37  ;;  %v2002_v23 = vld [vmem:[#allocation49_spill] sm:$0xff]  ;;  %v2008_v37 = vld [vmem:[#allocation38_spill] sm:$0xff] }
 0x298   :  { %v1036_v43 = vpop.eup %1035  ;;  %v481_v33 = vadd.f32 %v480_v48, %v466_v12  ;;  %722 = vmin.xlane.f32.xlu0 %v721_v8 }
 0x299   :  { %v348_v1 = vmul.f32 0.6931472, %v1036_v43  ;;  %v1748_v4 = vpop.xlane.xlu1 %774  ;;  %v457_v61 = vsub.f32 %v375_v60, %v1992_v26  ;;  %v800_v12 = vcvt.s32.f32 %v798_v17  ;;  %v547_v60 = vrot.slane %v2002_v23, 4 }
 0x29a   :  { %v482_v56 = vadd.f32 %v481_v33, %v1681_v11  ;;  %vm776_vm5 = vcmp.eq.f32.partialorder %v1984_v59, %v1748_v4  ;;  %v1038_v24 = vpop.eup %1037 }
 0x29b   :  { %v372_v49 = vadd.f32 %v348_v1, %v1986_v7  ;;  %v777_v48 = vsel %vm776_vm5, %v772_v51, inf  ;;  %v473_v14 = vsel %vm441_vm11, %v457_v61, 0.0  ;;  %v1996_v1 = vld [vmem:[#allocation41_spill] sm:$0xff]  ;;  %v2006_v61 = vld [vmem:[#allocation42_spill] sm:$0xff] }
 0x29c   :  { %v483_v25 = vadd.f32 %v482_v56, %v1652_v54  ;;  %778 = vmin.xlane.f32.xlu2 %v777_v48  ;;  %v456_v54 = vsub.f32 %v374_v29, %v1990_v35  ;;  %v1040_v8 = vpop.eup %1039  ;;  %v1997_v56 = vld [vmem:[#allocation50_spill] sm:$0xff]  ;;  %v1999_v7 = vld [vmem:[#allocation37_spill] sm:$0xff]  ;;  %v2000_v48 = vld [vmem:[#allocation23_spill] sm:$0xff]  ;;  %vm2007_vm8 = vcmp.eq.s32.totalorder %v1224_v31, %v2006_v61 }
 0x29d   :  { %v454_v45 = vsub.f32 %v372_v49, %v1989_v30  ;;  %v1761_v11 = vpop.xlane.xlu2 %760  ;;  %v362_v9 = vmul.f32 0.6931472, %v1040_v8 }
 0x29e   :  { %v484_v3 = vadd.f32 %v483_v25, %v469_v13  ;;  %vm762_vm4 = vcmp.eq.f32.partialorder %v1621_v62, %v1761_v11  ;;  %v472_v50 = vsel %vm440_vm9, %v456_v54, 0.0  ;;  %v2009_v62 = vld [vmem:[#allocation48_spill] sm:$0xff] }
 0x29f   :  { %v470_v34 = vsel %vm438_vm7, %v454_v45, 0.0  ;;  %v763_v58 = vsel %vm762_vm4, %v758_v41, inf  ;;  %v379_v29 = vadd.f32 %v362_v9, %v1998_v15  ;;  %v2003_v45 = vld [vmem:[#allocation33_spill] sm:$0xff]  ;;  %vm2010_vm9 = vcmp.eq.s32.totalorder %v1224_v31, %v2009_v62  ;;  %v2011_v31 = vld [vmem:[#allocation8_spill] sm:$0xff] }
 0x2a0   :  { %v485_v28 = vadd.f32 %v484_v3, %v470_v34  ;;  %764 = vmin.xlane.f32.xlu0 %v763_v58  ;;  %v2005_v34 = vld [vmem:[#allocation51_spill] sm:$0xff]  ;;  %vm205_vm11 = vcmp.ge.s32.totalorder %v2011_v31, 0 }
 0x2a1   :  { %v324_v2 = vpop.xlane.xlu1 %323  ;;  %v461_v41 = vsub.f32 %v379_v29, %v2003_v45  ;;  %v641_v45 = vcvt.f32.s32 %v1719_v63 }
 0x2a2   :  { %v486_v53 = vadd.f32 %v485_v28, %v1688_v5  ;;  %1041 = vlog2.f32 %v324_v2  ;;  %v360_v5 = vmul.f32 0.6931472, %v1038_v24  ;;  %v548_v28 = vadd.f32 %v547_v60, %v2002_v23  ;;  %v2013_v60 = vld [vmem:[#allocation10_spill] sm:$0xff] }
 0x2a3   :  { %v477_v2 = vsel %vm2007_vm8, %v461_v41, 0.0  ;;  %vm207_vm14 = vcmp.ge.s32.totalorder %v2013_v60, 0 }
 0x2a4   :  { %v487_v22 = vadd.f32 %v486_v53, %v472_v50  ;;  %v378_v51 = vadd.f32 %v360_v5, %v1996_v1  ;;  %v549_v50 = vrot.slane %v548_v28, 2  ;;  %v600_v5 = vshll.u32 %v599_v19, 16 }
 0x2a5   :  { %v1779_v57 = vpop.xlane.xlu2 %802  ;;  %v613_v1 = vcvt.f32.s32 %v1637_v44 }
 0x2a6   :  { %v488_v43 = vadd.f32 %v487_v22, %v473_v14  ;;  %vm804_vm7 = vcmp.eq.f32.partialorder %v1628_v18, %v1779_v57  ;;  %v460_v25 = vsub.f32 %v378_v51, %v2000_v48  ;;  %v2012_v18 = vld [vmem:[#allocation9_spill] sm:$0xff] }
 0x2a7   :  { %v805_v33 = vsel %vm804_vm7, %v800_v12, inf  ;;  %v550_v12 = vadd.f32 %v549_v50, %v548_v28  ;;  %v614_v29 = vshll.u32 %v613_v1, 16  ;;  %v2018_v1 = vld [vmem:[#allocation15_spill] sm:$0xff] }
 0x2a8   :  { %v1042_v16 = vpop.eup %1041  ;;  %806 = vmin.xlane.f32.xlu0 %v805_v33  ;;  %v476_v52 = vsel %vm444_vm0, %v460_v25, 0.0  ;;  %v627_v25 = vcvt.f32.s32 %v1654_v55  ;;  %vm206_vm0 = vcmp.ge.s32.totalorder %v2012_v18, 0  ;;  %v655_v55 = vcvt.f32.s32 %v1646_v36 }
 0x2a9   :  { %v356_v39 = vmul.f32 0.6931472, %v1042_v16  ;;  %v332_v42 = vpop.xlane.xlu1 %331  ;;  %v551_v9 = vrot.slane %v550_v12, 1  ;;  %v669_v36 = vcvt.f32.s32 %v1661_v20  ;;  %vm212_vm13 = vcmp.ge.s32.totalorder %v2018_v1, 0 }
 0x2aa   :  { %1043 = vlog2.f32 %v332_v42 }
 0x2ab   :  { %v376_v59 = vadd.f32 %v356_v39, %v1997_v56  ;;  %v552_v15 = vadd.f32 %v551_v9, %v550_v12 }
 0x2ad   :  { %v458_v49 = vsub.f32 %v376_v59, %v1999_v7  ;;  %v597_v22 = vpop.xlane.xlu2 %596 }
 0x2af   :  { %v474_v0 = vsel %vm442_vm12, %v458_v49, 0.0  ;;  %vm553_vm12 = vcmask 1040384  }
 0x2b0   :  { %v1044_v13 = vpop.eup %1043  ;;  %v489_v30 = vadd.f32 %v488_v43, %v474_v0  ;;  %v598_v43 = vcvt.f32.s32 %v597_v22  ;;  %v2016_v22 = vld [vmem:[#allocation13_spill] sm:$0xff] }
 0x2b1   :  { %v364_v3 = vmul.f32 0.6931472, %v1044_v13  ;;  %v611_v16 = vpop.xlane.xlu1 %610  ;;  %v628_v13 = vshll.u32 %v627_v25, 16  ;;  %vm210_vm10 = vcmp.ge.s32.totalorder %v2016_v22, 0  ;;  %v2020_v25 = vld [vmem:[#allocation17_spill] sm:$0xff] }
 0x2b2   :  { %v490_v35 = vadd.f32 %v489_v30, %v1700_v46  ;;  %v601_v39 = vadd.s32 %v600_v5, %v598_v43  ;;  %v612_v56 = vcvt.f32.s32 %v611_v16  ;;  %v697_v43 = vcvt.f32.s32 %v1711_v27  ;;  %v2017_v5 = vld [vmem:[#allocation14_spill] sm:$0xff] }
 0x2b3   :  { %v380_v58 = vadd.f32 %v364_v3, %v2005_v34  ;;  %v642_v3 = vshll.u32 %v641_v45, 16  ;;  %v2014_v34 = vld [vmem:[#allocation11_spill] sm:$0xff]  ;;  %vm211_vm2 = vcmp.ge.s32.totalorder %v2017_v5, 0  ;;  %vm214_vm15 = vcmp.ge.s32.totalorder %v2020_v25, 0 }
 0x2b4   :  { %v491_v26 = vadd.f32 %v490_v35, %v476_v52  ;;  %v812_v59 = vsel %vm205_vm11, %v601_v39, %v2011_v31  ;;  %v615_v49 = vadd.s32 %v614_v29, %v612_v56  ;;  %vm208_vm1 = vcmp.ge.s32.totalorder %v2014_v34, 0 }
 0x2b5   :  { %v462_v17 = vsub.f32 %v380_v58, %v2008_v37  ;;  %v653_v54 = vpop.xlane.xlu2 %652  ;;  %v698_v9 = vshll.u32 %v697_v43, 16 }
 0x2b6   :  { %v492_v53 = vadd.f32 %v491_v26, %v477_v2  ;;  %v813_v0 = vsel %vm206_vm0, %v615_v49, %v2012_v18  ;;  %v654_v58 = vcvt.f32.s32 %v653_v54  ;;  %v656_v26 = vshll.u32 %v655_v55, 16  ;;  %v2015_v2 = vld [vmem:[#allocation12_spill] sm:$0xff]  ;;  %v2022_v54 = vld [vmem:[#allocation19_spill] sm:$0xff] }
 0x2b7   :  { %v478_v46 = vsel %vm2010_vm9, %v462_v17, 0.0  ;;  %vm209_vm6 = vcmp.ge.s32.totalorder %v2015_v2, 0  ;;  %vm216_vm4 = vcmp.ge.s32.totalorder %v2022_v54, 0 }
 0x2b8   :  { %v493_v24 = vadd.f32 %v492_v53, %v478_v46  ;;  %v657_v61 = vadd.s32 %v656_v26, %v654_v58  ;;  %v670_v53 = vshll.u32 %v669_v36, 16  ;;  %v2023_v26 = vld [vmem:[#allocation20_spill] sm:$0xff] }
 0x2b9   :  { %v625_v48 = vpop.xlane.xlu1 %624  ;;  %vm217_vm7 = vcmp.ge.s32.totalorder %v2023_v26, 0 }
 0x2ba   :  { %v494_v14 = vrot.slane %v493_v24, 4  ;;  %v626_v44 = vcvt.f32.s32 %v625_v48  ;;  %v816_v17 = vsel %vm209_vm6, %v657_v61, %v2015_v2 }
 0x2bc   :  { %v495_v8 = vadd.f32 %v494_v14, %v493_v24  ;;  %v629_v23 = vadd.s32 %v628_v13, %v626_v44  ;;  %v683_v24 = vcvt.f32.s32 %v1702_v10 }
 0x2be   :  { %v496_v33 = vrot.slane %v495_v8, 2  ;;  %v814_v30 = vsel %vm207_vm14, %v629_v23, %v2013_v60  ;;  %v684_v20 = vshll.u32 %v683_v24, 16  ;;  %v2021_v60 = vld [vmem:[#allocation18_spill] sm:$0xff]  ;;  %v809_v24 = vcvt.f32.s32 %v1779_v57 }
 0x2bf   :  { %vm215_vm5 = vcmp.ge.s32.totalorder %v2021_v60, 0 }
 0x2c0   :  { %v497_v42 = vadd.f32 %v496_v33, %v495_v8 }
 0x2c1   :  { %v667_v63 = vpop.xlane.xlu1 %666 }
 0x2c2   :  { %v498_v51 = vrot.slane %v497_v42, 1  ;;  %v668_v37 = vcvt.f32.s32 %v667_v63 }
 0x2c4   :  { %v499_v40 = vadd.f32 %v498_v51, %v497_v42  ;;  %v671_v62 = vadd.s32 %v670_v53, %v668_v37  ;;  %v711_v42 = vcvt.f32.s32 %v1667_v47  ;;  %v739_v47 = vcvt.f32.s32 %v1704_v21 }
 0x2c5   :  { %828 = vxpose.xlu2.b32.start [1/16] (narrow) %v812_v59, 8  ;;  %v795_v37 = vcvt.f32.s32 %v1732_v38  ;;  %v2026_v38 = vld [vmem:[#allocation36_spill] sm:$0xff] }
 0x2c6   :  { %v554_v7 = vsel %vm553_vm12, %v499_v40, %v552_v15  ;;  %v817_v14 = vsel %vm210_vm10, %v671_v62, %v2016_v22  ;;  %v712_v56 = vshll.u32 %v711_v42, 16  ;;  %v725_v40 = vcvt.f32.s32 %v1690_v6  ;;  %v2019_v15 = vld [vmem:[#allocation16_spill] sm:$0xff] }
 0x2c7   :  { %555 = vst [vmem:[#allocation4] sm:$0x3] %v554_v7  ;;  %vm213_vm3 = vcmp.ge.s32.totalorder %v2019_v15, 0  ;;  %v753_v6 = vcvt.f32.s32 %v1724_v32  ;;  %v2025_v22 = vld [vmem:[#allocation28_spill] sm:$0xff]  ;;  %vm220_vm11 = vcmp.ge.s32.totalorder %v2026_v38, 0 }
 0x2c8   :  { %882 = dma.vmem_to_hbm [thread:$0]  %s878_s3, 32, %s880_s17, [#allocation5]   ;;  %v726_v49 = vshll.u32 %v725_v40, 16  ;;  %vm219_vm9 = vcmp.ge.s32.totalorder %v2025_v22, 0 }
 0x2c9   :  { %v709_v10 = vpop.xlane.xlu1 %708 }
 0x2ca   :  { %v710_v51 = vcvt.f32.s32 %v709_v10 }
 0x2cc   :  { %v713_v59 = vadd.s32 %v712_v56, %v710_v51 }
 0x2cd   :  { %829 = vxpose.xlu2.b32.cont [2/16] (narrow) %v813_v0, 8  ;;  %v740_v0 = vshll.u32 %v739_v47, 16 }
 0x2ce   :  { %v820_v7 = vsel %vm213_vm3, %v713_v59, %v2019_v15 }
 0x2d5   :  { %830 = vxpose.xlu2.b32.cont [3/16] (narrow) %v814_v30, 8 }
 0x2e4   :  { %v737_v46 = vpop.xlane.xlu2 %736 }
 0x2e5   :  { %v738_v18 = vcvt.f32.s32 %v737_v46  ;;  %v796_v46 = vshll.u32 %v795_v37, 16 }
 0x2e7   :  { %v741_v13 = vadd.s32 %v740_v0, %v738_v18 }
 0x2e9   :  { %v822_v45 = vsel %vm215_vm5, %v741_v13, %v2021_v60 }
 0x2f7   :  { %v695_v8 = vpop.xlane.xlu2 %694 }
 0x2f8   :  { %v696_v33 = vcvt.f32.s32 %v695_v8 }
 0x2fa   :  { %v699_v39 = vadd.s32 %v698_v9, %v696_v33 }
 0x2fb   :  { %v639_v41 = vpop.xlane.xlu0 %638 }
 0x2fc   :  { %v640_v35 = vcvt.f32.s32 %v639_v41  ;;  %v819_v31 = vsel %vm212_vm13, %v699_v39, %v2018_v1  ;;  %v754_v41 = vshll.u32 %v753_v6, 16 }
 0x2fe   :  { %v643_v52 = vadd.s32 %v642_v3, %v640_v35  ;;  %v767_v35 = vcvt.f32.s32 %v1761_v11 }
 0x2ff   :  { %v751_v23 = vpop.xlane.xlu1 %750 }
 0x300   :  { %v815_v28 = vsel %vm208_vm1, %v643_v52, %v2014_v34  ;;  %v752_v30 = vcvt.f32.s32 %v751_v23  ;;  %v768_v34 = vshll.u32 %v767_v35, 16 }
 0x301   :  { %831 = vxpose.xlu2.b32.cont [4/16] (narrow) %v815_v28, 8  ;;  %v781_v28 = vcvt.f32.s32 %v1748_v4 }
 0x302   :  { %v755_v3 = vadd.s32 %v754_v41, %v752_v30 }
 0x303   :  { %v681_v50 = vpop.xlane.xlu0 %680  ;;  %v782_v36 = vshll.u32 %v781_v28, 16 }
 0x304   :  { %v682_v19 = vcvt.f32.s32 %v681_v50  ;;  %v823_v52 = vsel %vm216_vm4, %v755_v3, %v2022_v54 }
 0x306   :  { %v685_v12 = vadd.s32 %v684_v20, %v682_v19  ;;  %v810_v20 = vshll.u32 %v809_v24, 16 }
 0x307   :  { %v793_v11 = vpop.xlane.xlu1 %792 }
 0x308   :  { %v818_v16 = vsel %vm211_vm2, %v685_v12, %v2017_v5  ;;  %v794_v53 = vcvt.f32.s32 %v793_v11 }
 0x309   :  { %832 = vxpose.xlu2.b32.cont [5/16] (narrow) %v816_v17, 8  ;;  %v2024_v17 = vld [vmem:[#allocation26_spill] sm:$0xff] }
 0x30a   :  { %vm218_vm8 = vcmp.ge.s32.totalorder %v2024_v17, 0  ;;  %v797_v50 = vadd.s32 %v796_v46, %v794_v53 }
 0x30b   :  { %v723_v27 = vpop.xlane.xlu0 %722 }
 0x30c   :  { %v724_v29 = vcvt.f32.s32 %v723_v27 }
 0x30e   :  { %v727_v48 = vadd.s32 %v726_v49, %v724_v29 }
 0x30f   :  { %v779_v32 = vpop.xlane.xlu2 %778 }
 0x310   :  { %v821_v44 = vsel %vm214_vm15, %v727_v48, %v2020_v25  ;;  %v780_v61 = vcvt.f32.s32 %v779_v32 }
 0x311   :  { %833 = vxpose.xlu2.b32.cont [6/16] (narrow) %v817_v14, 8  ;;  %v826_v14 = vsel %vm219_vm9, %v797_v50, %v2025_v22 }
 0x312   :  { %v783_v2 = vadd.s32 %v782_v36, %v780_v61 }
 0x313   :  { %v765_v21 = vpop.xlane.xlu0 %764 }
 0x314   :  { %v766_v55 = vcvt.f32.s32 %v765_v21  ;;  %v825_v62 = vsel %vm218_vm8, %v783_v2, %v2024_v17 }
 0x316   :  { %v769_v58 = vadd.s32 %v768_v34, %v766_v55 }
 0x318   :  { %v824_v63 = vsel %vm217_vm7, %v769_v58, %v2023_v26 }
 0x319   :  { %834 = vxpose.xlu2.b32.cont [7/16] (narrow) %v818_v16, 8 }
 0x31b   :  { %v807_v4 = vpop.xlane.xlu0 %806 }
 0x31c   :  { %v808_v19 = vcvt.f32.s32 %v807_v4 }
 0x31e   :  { %v811_v12 = vadd.s32 %v810_v20, %v808_v19 }
 0x320   :  { %v827_v8 = vsel %vm220_vm11, %v811_v12, %v2026_v38 }
 0x321   :  { %835 = vxpose.xlu2.b32.cont [8/16] (narrow) %v819_v31, 8 }
 0x329   :  { %836 = vxpose.xlu2.b32.cont [9/16] (narrow) %v820_v7, 8 }
 0x331   :  { %837 = vxpose.xlu2.b32.cont [10/16] (narrow) %v821_v44, 8 }
 0x339   :  { %838 = vxpose.xlu2.b32.cont [11/16] (narrow) %v822_v45, 8 }
 0x341   :  { %839 = vxpose.xlu2.b32.cont [12/16] (narrow) %v823_v52, 8 }
 0x349   :  { %840 = vxpose.xlu2.b32.cont [13/16] (narrow) %v824_v63, 8 }
 0x351   :  { %841 = vxpose.xlu2.b32.cont [14/16] (narrow) %v825_v62, 8 }
 0x359   :  { %842 = vxpose.xlu2.b32.cont [15/16] (narrow) %v826_v14, 8 }
 0x361   :  { %843 = vxpose.xlu2.b32.end [16/16] (narrow) %v827_v8, 8 }
 0x382   :  { %v844_v57 = vpop.trf.xlu2 }
 0x383   :  { %860 = vst [vmem:[#allocation2] sm:$0x1] %v844_v57 }
 0x384   :  { %871 = dma.vmem_to_hbm [thread:$0]  %s867_s18, 16, %s869_s21, [#allocation3]  }
 0x385   :  { %1093 = dma.done.wait [#allocation3], 16  }
 0x386   :  { %1094 = vsyncadd [#allocation3], 4294967280 }
 0x387   :  { %1095 = dma.done.wait [#allocation5], 32  }
 0x388   :  { %1096 = vsyncadd [#allocation5], 4294967264 }
 0x389   :  { %891 = vsyncpa [#allocation3], 1 }
 0x38a   :  { %892 = vsyncpa [#allocation5], 1 }

</bundles_post_ra>
